<compile_context>
chip_gen: v6e
topology: v6e:2x2x1
jax: 0.10.0
libtpu: 0.0.40
codegen_flags: <defaults>
</compile_context>

<pallas_src>
import functools

import jax
import jax.numpy as jnp
from jax.experimental import pallas as pl
from jax.experimental.pallas import tpu as pltpu

H1, H2, H3 = 200, 100, 50                 # logical hidden widths (match nn.Linear)
H1_PAD, H2_PAD, H3_PAD = 256, 128, 128    # lane-dense padded widths


def _round_up(x, m):
    return ((x + m - 1) // m) * m


def actor_kernel(x_ref, w1_ref, w2_ref, w3_ref, w4_ref, b_ref, o_ref,
                 *, action_bound, d_out_pad):
    # bf16 only as MXU inputs; f32 accumulation and f32 VPU/EUP elementwise math.
    x = x_ref[...].astype(jnp.bfloat16)

    h = jnp.dot(x, w1_ref[...], preferred_element_type=jnp.float32)
    h = jnp.maximum(h + b_ref[0:1, :H1_PAD], 0.0)

    h = jnp.dot(h.astype(jnp.bfloat16), w2_ref[...],
                preferred_element_type=jnp.float32)
    h = jnp.maximum(h + b_ref[1:2, :H2_PAD], 0.0)

    h = jnp.dot(h.astype(jnp.bfloat16), w3_ref[...],
                preferred_element_type=jnp.float32)
    h = jnp.maximum(h + b_ref[2:3, :H3_PAD], 0.0)

    logits = jnp.dot(h.astype(jnp.bfloat16), w4_ref[...],
                     preferred_element_type=jnp.float32)
    logits = logits + b_ref[3:4, :d_out_pad]

    # bf16 writeback (halves the output HBM stream); wrapper casts back to f32.
    o_ref[...] = (jax.nn.sigmoid(logits)
                  * jnp.float32(action_bound)).astype(o_ref.dtype)


def pack_params(params, input_dim, output_dim):
    """Pad + cast f32 (in, out)-layout params into the kernel's tiled layout."""
    d_in_k = _round_up(input_dim, 16)        # bf16 sublane-friendly, NOT 128
    d_out_pad = _round_up(output_dim, 128)
    raw = [(input_dim, H1), (H1, H2), (H2, H3), (H3, output_dim)]
    pad = [(d_in_k, H1_PAD), (H1_PAD, H2_PAD), (H2_PAD, H3_PAD),
           (H3_PAD, d_out_pad)]
    b_width = max(H1_PAD, d_out_pad)

    ws = []
    b_pack = jnp.zeros((8, b_width), jnp.float32)
    for k, ((fi, fo), (pi, po)) in enumerate(zip(raw, pad), start=1):
        w = jnp.zeros((pi, po), jnp.float32).at[:fi, :fo].set(params[f"w{k}"])
        ws.append(w.astype(jnp.bfloat16))
        b_pack = b_pack.at[k - 1, :fo].set(jnp.reshape(params[f"b{k}"], (-1,)))
    return tuple(ws), b_pack


def _choose_batch_tiling(B, tile_b):
    """Pick (tile, b_pad): sublane-aligned tile, >= 2 grid steps when possible."""
    if B <= 8:
        tile = 8                                   # single tiny step
    else:
        # aim for tile near tile_b but never fewer than 2 grid steps,
        # so v7x's second TensorCore gets work via the "parallel" axis.
        tile = max(8, min(tile_b, _round_up(pl.cdiv(B, 2), 8)))
    return tile, _round_up(B, tile)


def actor_forward(state, packed_ws, packed_b, action_bound, output_dim,
                  tile_b=512):
    """state: (B, input_dim) f32. Returns (B, output_dim) f32."""
    B, d_in = state.shape
    d_in_k = _round_up(d_in, 16)
    d_out_pad = _round_up(output_dim, 128)
    w1, w2, w3, w4 = packed_ws
    assert w1.shape == (d_in_k, H1_PAD)
    b_width = packed_b.shape[1]

    tile, b_pad = _choose_batch_tiling(B, tile_b)
    grid_len = b_pad // tile

    # Only materialize a padded copy of x when actually required; the common
    # aligned case (and the demo) passes `state` straight through.
    if (b_pad != B) or (d_in_k != d_in):
        x = jnp.zeros((b_pad, d_in_k), jnp.float32).at[:B, :d_in].set(
            state.astype(jnp.float32))
    else:
        x = state.astype(jnp.float32)

    kernel = functools.partial(actor_kernel,
                               action_bound=float(action_bound),
                               d_out_pad=d_out_pad)

    flops = 2 * b_pad * (d_in_k * H1_PAD + H1_PAD * H2_PAD
                         + H2_PAD * H3_PAD + H3_PAD * d_out_pad)
    bytes_accessed = (x.size * 4 + packed_b.size * 4 + b_pad * d_out_pad * 2
                      + 2 * (w1.size + w2.size + w3.size + w4.size))

    compiler_kwargs = dict(dimension_semantics=("parallel",))
    if tile >= 2048:
        # v5e default scoped VMEM (~16 MiB) is the only generation that needs
        # an explicit bump at very large tiles; 48 MiB still fits v7x's 64 MiB.
        compiler_kwargs["vmem_limit_bytes"] = 48 * 1024 * 1024

    out = pl.pallas_call(
        kernel,
        out_shape=jax.ShapeDtypeStruct((b_pad, d_out_pad), jnp.bfloat16),
        grid=(grid_len,),
        in_specs=[
            pl.BlockSpec((tile, d_in_k), lambda i: (i, 0)),       # state tile
            pl.BlockSpec((d_in_k, H1_PAD), lambda i: (0, 0)),     # w1 (VMEM-resident)
            pl.BlockSpec((H1_PAD, H2_PAD), lambda i: (0, 0)),     # w2
            pl.BlockSpec((H2_PAD, H3_PAD), lambda i: (0, 0)),     # w3
            pl.BlockSpec((H3_PAD, d_out_pad), lambda i: (0, 0)),  # w4
            pl.BlockSpec((8, b_width), lambda i: (0, 0)),         # packed biases
        ],
        out_specs=pl.BlockSpec((tile, d_out_pad), lambda i: (i, 0)),
        compiler_params=pltpu.CompilerParams(**compiler_kwargs),
        cost_estimate=pl.CostEstimate(
            flops=flops,
            transcendentals=b_pad * d_out_pad,
            bytes_accessed=int(bytes_accessed)),
    )(x, w1, w2, w3, w4, packed_b)

    return out[:B, :output_dim].astype(jnp.float32)


def init_actor_params(key, input_dim, output_dim):
    """Deterministic init mimicking nn.Linear's uniform(-1/sqrt(fan_in), +)."""
    dims = [(input_dim, H1), (H1, H2), (H2, H3), (H3, output_dim)]
    params = {}
    for idx, (fan_in, fan_out) in enumerate(dims, start=1):
        key, kw, kb = jax.random.split(key, 3)
        bound = 1.0 / jnp.sqrt(jnp.float32(fan_in))
        params[f"w{idx}"] = jax.random.uniform(
            kw, (fan_in, fan_out), jnp.float32, -bound, bound)
        params[f"b{idx}"] = jax.random.uniform(
            kb, (1, fan_out), jnp.float32, -bound, bound)
    return params


def actor_reference(state, params, action_bound):
    x = jnp.maximum(state @ params["w1"] + params["b1"], 0.0)
    x = jnp.maximum(x @ params["w2"] + params["b2"], 0.0)
    x = jnp.maximum(x @ params["w3"] + params["b3"], 0.0)
    return jax.nn.sigmoid(x @ params["w4"] + params["b4"]) * action_bound


if __name__ == "__main__":
    key = jax.random.PRNGKey(0)
    input_dim, output_dim = 32, 4
    action_bound = 2.0

    kp, kx1, kx2 = jax.random.split(key, 3)
    params = init_actor_params(kp, input_dim, output_dim)
    packed_ws, packed_b = pack_params(params, input_dim, output_dim)

    # Tiny batch (single-step grid, zero-copy x path).
    state_small = jax.random.normal(kx1, (8, input_dim), jnp.float32)
    out_small = jax.block_until_ready(
        actor_forward(state_small, packed_ws, packed_b, action_bound, output_dim))
    ref_small = actor_reference(state_small, params, action_bound)
    assert out_small.shape == (8, output_dim)
    # bf16 weights/activations/output vs f32 reference -> loose tolerance.
    assert jnp.allclose(out_small, ref_small, atol=2e-2, rtol=2e-2), \
        "small-batch mismatch vs reference"

    # Larger, non-tile-aligned batch exercising the 2-step "parallel" grid.
    state_big = jax.random.normal(kx2, (300, input_dim), jnp.float32)
    out_big = jax.block_until_ready(
        actor_forward(state_big, packed_ws, packed_b, action_bound, output_dim))
    ref_big = actor_reference(state_big, params, action_bound)
    assert out_big.shape == (300, output_dim)
    assert jnp.allclose(out_big, ref_big, atol=2e-2, rtol=2e-2), \
        "large-batch mismatch vs reference"

    print("KERNEL_OK")
</pallas_src>

<mosaic_0001>
module attributes {stable_mosaic.version = 11 : i64} {
  func.func @actor_kernel(%arg0: i32, %arg1: memref<8x32xf32, #tpu.memory_space<vmem>>, %arg2: memref<32x256xbf16, #tpu.memory_space<vmem>>, %arg3: memref<256x128xbf16, #tpu.memory_space<vmem>>, %arg4: memref<128x128xbf16, #tpu.memory_space<vmem>>, %arg5: memref<128x128xbf16, #tpu.memory_space<vmem>>, %arg6: memref<8x256xf32, #tpu.memory_space<vmem>>, %arg7: memref<8x128xbf16, #tpu.memory_space<vmem>>) attributes {dimension_semantics = [#tpu.dimension_semantics<parallel>], iteration_bounds = array<i64: 1>, scalar_prefetch = 0 : i64, scratch_operands = 0 : i64, tpu.core_type = #tpu.core_type<tc>, window_params = [{transform_indices = @transform_0, window_bounds = array<i64: 8, 32>}, {pipeline_mode = #tpu.pipeline_mode<synchronous>, transform_indices = @transform_1, window_bounds = array<i64: 32, 256>}, {pipeline_mode = #tpu.pipeline_mode<synchronous>, transform_indices = @transform_2, window_bounds = array<i64: 256, 128>}, {pipeline_mode = #tpu.pipeline_mode<synchronous>, transform_indices = @transform_3, window_bounds = array<i64: 128, 128>}, {pipeline_mode = #tpu.pipeline_mode<synchronous>, transform_indices = @transform_4, window_bounds = array<i64: 128, 128>}, {pipeline_mode = #tpu.pipeline_mode<synchronous>, transform_indices = @transform_5, window_bounds = array<i64: 8, 256>}, {transform_indices = @transform_6, window_bounds = array<i64: 8, 128>}]} {
    %c0 = arith.constant 0 : index
    %c0_0 = arith.constant 0 : index
    %0 = vector.load %arg1[%c0, %c0_0] : memref<8x32xf32, #tpu.memory_space<vmem>>, vector<8x32xf32>
    %1 = arith.truncf %0 : vector<8x32xf32> to vector<8x32xbf16>
    %c0_1 = arith.constant 0 : index
    %c0_2 = arith.constant 0 : index
    %2 = vector.load %arg2[%c0_1, %c0_2] : memref<32x256xbf16, #tpu.memory_space<vmem>>, vector<32x256xbf16>
    %cst = arith.constant dense<0.000000e+00> : vector<8x256xf32>
    %3 = tpu.matmul %1, %2, %cst {dimension_numbers = #tpu.dot_dimension_numbers<[1], [0], [0], [1], [0, 0, 1, 1], [], []>} : vector<8x32xbf16>, vector<32x256xbf16>, vector<8x256xf32> -> vector<8x256xf32>
    %c0_3 = arith.constant 0 : index
    %c0_4 = arith.constant 0 : index
    %4 = vector.load %arg6[%c0_3, %c0_4] : memref<8x256xf32, #tpu.memory_space<vmem>>, vector<1x256xf32>
    %5 = vector.broadcast %4 : vector<1x256xf32> to vector<8x256xf32>
    %6 = arith.addf %3, %5 : vector<8x256xf32>
    %cst_5 = arith.constant 0.000000e+00 : f32
    %7 = vector.broadcast %cst_5 : f32 to vector<8x256xf32>
    %8 = arith.maximumf %6, %7 : vector<8x256xf32>
    %9 = arith.truncf %8 : vector<8x256xf32> to vector<8x256xbf16>
    %c0_6 = arith.constant 0 : index
    %c0_7 = arith.constant 0 : index
    %10 = vector.load %arg3[%c0_6, %c0_7] : memref<256x128xbf16, #tpu.memory_space<vmem>>, vector<256x128xbf16>
    %cst_8 = arith.constant dense<0.000000e+00> : vector<8x128xf32>
    %11 = tpu.matmul %9, %10, %cst_8 {dimension_numbers = #tpu.dot_dimension_numbers<[1], [0], [0], [1], [0, 0, 1, 1], [], []>} : vector<8x256xbf16>, vector<256x128xbf16>, vector<8x128xf32> -> vector<8x128xf32>
    %c1 = arith.constant 1 : index
    %c0_9 = arith.constant 0 : index
    %12 = vector.load %arg6[%c1, %c0_9] : memref<8x256xf32, #tpu.memory_space<vmem>>, vector<1x128xf32>
    %13 = vector.broadcast %12 : vector<1x128xf32> to vector<8x128xf32>
    %14 = arith.addf %11, %13 : vector<8x128xf32>
    %cst_10 = arith.constant 0.000000e+00 : f32
    %15 = vector.broadcast %cst_10 : f32 to vector<8x128xf32>
    %16 = arith.maximumf %14, %15 : vector<8x128xf32>
    %17 = arith.truncf %16 : vector<8x128xf32> to vector<8x128xbf16>
    %c0_11 = arith.constant 0 : index
    %c0_12 = arith.constant 0 : index
    %18 = vector.load %arg4[%c0_11, %c0_12] : memref<128x128xbf16, #tpu.memory_space<vmem>>, vector<128x128xbf16>
    %cst_13 = arith.constant dense<0.000000e+00> : vector<8x128xf32>
    %19 = tpu.matmul %17, %18, %cst_13 {dimension_numbers = #tpu.dot_dimension_numbers<[1], [0], [0], [1], [0, 0, 1, 1], [], []>} : vector<8x128xbf16>, vector<128x128xbf16>, vector<8x128xf32> -> vector<8x128xf32>
    %c2 = arith.constant 2 : index
    %c0_14 = arith.constant 0 : index
    %20 = vector.load %arg6[%c2, %c0_14] : memref<8x256xf32, #tpu.memory_space<vmem>>, vector<1x128xf32>
    %21 = vector.broadcast %20 : vector<1x128xf32> to vector<8x128xf32>
    %22 = arith.addf %19, %21 : vector<8x128xf32>
    %cst_15 = arith.constant 0.000000e+00 : f32
    %23 = vector.broadcast %cst_15 : f32 to vector<8x128xf32>
    %24 = arith.maximumf %22, %23 : vector<8x128xf32>
    %25 = arith.truncf %24 : vector<8x128xf32> to vector<8x128xbf16>
    %c0_16 = arith.constant 0 : index
    %c0_17 = arith.constant 0 : index
    %26 = vector.load %arg5[%c0_16, %c0_17] : memref<128x128xbf16, #tpu.memory_space<vmem>>, vector<128x128xbf16>
    %cst_18 = arith.constant dense<0.000000e+00> : vector<8x128xf32>
    %27 = tpu.matmul %25, %26, %cst_18 {dimension_numbers = #tpu.dot_dimension_numbers<[1], [0], [0], [1], [0, 0, 1, 1], [], []>} : vector<8x128xbf16>, vector<128x128xbf16>, vector<8x128xf32> -> vector<8x128xf32>
    %c3 = arith.constant 3 : index
    %c0_19 = arith.constant 0 : index
    %28 = vector.load %arg6[%c3, %c0_19] : memref<8x256xf32, #tpu.memory_space<vmem>>, vector<1x128xf32>
    %29 = vector.broadcast %28 : vector<1x128xf32> to vector<8x128xf32>
    %30 = arith.addf %27, %29 : vector<8x128xf32>
    %31 = arith.negf %30 : vector<8x128xf32>
    %32 = math.exp %31 : vector<8x128xf32>
    %cst_20 = arith.constant 1.000000e+00 : f32
    %33 = vector.broadcast %cst_20 : f32 to vector<8x128xf32>
    %34 = arith.addf %33, %32 : vector<8x128xf32>
    %35 = arith.divf %33, %34 : vector<8x128xf32>
    %cst_21 = arith.constant 2.000000e+00 : f32
    %36 = vector.broadcast %cst_21 : f32 to vector<8x128xf32>
    %37 = arith.mulf %35, %36 : vector<8x128xf32>
    %38 = arith.truncf %37 : vector<8x128xf32> to vector<8x128xbf16>
    %c0_22 = arith.constant 0 : index
    %c0_23 = arith.constant 0 : index
    %39 = vector.load %arg7[%c0_22, %c0_23] : memref<8x128xbf16, #tpu.memory_space<vmem>>, vector<8x128xbf16>
    tpu.vector_store %arg7[%c0_22, %c0_23], %38 {strides = array<i32>} : memref<8x128xbf16, #tpu.memory_space<vmem>>, vector<8x128xbf16>,
    return
  }
  func.func @transform_0(%arg0: i32) -> (i32, i32) {
    %c0_i32 = arith.constant 0 : i32
    %c0_i32_0 = arith.constant 0 : i32
    return %arg0, %c0_i32 : i32, i32
  }
  func.func @transform_1(%arg0: i32) -> (i32, i32) {
    %c0_i32 = arith.constant 0 : i32
    %c0_i32_0 = arith.constant 0 : i32
    %c0_i32_1 = arith.constant 0 : i32
    return %c0_i32, %c0_i32_0 : i32, i32
  }
  func.func @transform_2(%arg0: i32) -> (i32, i32) {
    %c0_i32 = arith.constant 0 : i32
    %c0_i32_0 = arith.constant 0 : i32
    %c0_i32_1 = arith.constant 0 : i32
    return %c0_i32, %c0_i32_0 : i32, i32
  }
  func.func @transform_3(%arg0: i32) -> (i32, i32) {
    %c0_i32 = arith.constant 0 : i32
    %c0_i32_0 = arith.constant 0 : i32
    %c0_i32_1 = arith.constant 0 : i32
    return %c0_i32, %c0_i32_0 : i32, i32
  }
  func.func @transform_4(%arg0: i32) -> (i32, i32) {
    %c0_i32 = arith.constant 0 : i32
    %c0_i32_0 = arith.constant 0 : i32
    %c0_i32_1 = arith.constant 0 : i32
    return %c0_i32, %c0_i32_0 : i32, i32
  }
  func.func @transform_5(%arg0: i32) -> (i32, i32) {
    %c0_i32 = arith.constant 0 : i32
    %c0_i32_0 = arith.constant 0 : i32
    %c0_i32_1 = arith.constant 0 : i32
    return %c0_i32, %c0_i32_0 : i32, i32
  }
  func.func @transform_6(%arg0: i32) -> (i32, i32) {
    %c0_i32 = arith.constant 0 : i32
    %c0_i32_0 = arith.constant 0 : i32
    return %arg0, %c0_i32 : i32, i32
  }
}

</mosaic_0001>

<bundles_post_ra>
// kernel: tpu_custom_call.1
= control target key start
LH: loop header
LB: loop body
LE: loop exit
PB: predicated region body
PF: predicated region fallthrough
CT: control target
= control target key end

     0   :  { %11 = vsyncpa [#allocation3], 0  ;;  %s1021_s0 = inlined_call_operand.hbm [shape: f32[8,32], index: 0, kind: input, shape index: {}]   ;;  %s1022_s1 = inlined_call_operand.hbm [shape: bf16[32,256], index: 1, kind: input, shape index: {}]   ;;  %s1023_s2 = inlined_call_operand.hbm [shape: bf16[256,128], index: 2, kind: input, shape index: {}]   ;;  %s1024_s3 = inlined_call_operand.hbm [shape: bf16[128,128], index: 3, kind: input, shape index: {}]   ;;  %s1025_s4 = inlined_call_operand.hbm [shape: bf16[128,128], index: 4, kind: input, shape index: {}]   ;;  %s1026_s5 = inlined_call_operand.hbm [shape: f32[8,256], index: 5, kind: input, shape index: {}]   ;;  %s1027_s6 = inlined_call_operand.hbm [shape: bf16[8,128], index: 6, kind: output, shape index: {}]  }
   0x1   :  { %12 = vsyncpa [#allocation6], 0 }
   0x2   :  { %13 = vsyncpa [#allocation9], 0 }
   0x3   :  { %14 = vsyncpa [#allocation12], 0 }
   0x4   :  { %15 = vsyncpa [#allocation4], 0  ;;  %s924_s21 = smov [#allocation5]  }
   0x5   :  { %s31_s22 = sshll.u32 %s924_s21, 4  ;;  %s32_s22 = int_to_ptr.vmem [resolvable:$true] %s31_s22 }
   0x6   :  { %s782_s23 = scalar_lea.vmem %s32_s22, 512  ;;  %p787_p1 = scmp.lt.s32.totalorder %s32_s22, %s32_s22 }
   0x7   :  { %p783_p0 = scmp.ne.s32.totalorder %s32_s22, %s782_s23  ;;  %p788_p2 = scmp.lt.s32.totalorder %s782_s23, %s782_s23 }
   0x9   :  { %p789_p3 = por %p788_p2, %p787_p1 }
   0xb   :  { %p790_p4 = pnand %p789_p3, %p783_p0 }
   0xd   :  { %793 = shalt.err (!%p790_p4)
}
   0xe   :  { %s925_s24 = smov 128   ;;  %s926_s25 = smov 8  }
   0xf   :  { %37 = dma.hbm_to_vmem [thread:$0]  %s1022_s1, 512, %s32_s22, [#allocation6], %s925_s24, %s925_s24, %s926_s25  }
  0x10   :  { %s927_s28 = smov [#allocation8]   ;;  %s928_s30 = smov [#allocation2]  }
  0x11   :  { %s55_s29 = sshll.u32 %s927_s28, 4  ;;  %s22_s7 = sshll.u32 %s928_s30, 4  ;;  %s56_s29 = int_to_ptr.vmem [resolvable:$true] %s55_s29  ;;  %s23_s7 = int_to_ptr.vmem [resolvable:$true] %s22_s7 }
  0x12   :  { %s802_s8 = scalar_lea.vmem %s56_s29, 1024  ;;  %p807_p6 = scmp.lt.s32.totalorder %s56_s29, %s56_s29 }
  0x13   :  { %p803_p5 = scmp.ne.s32.totalorder %s56_s29, %s802_s8  ;;  %p808_p7 = scmp.lt.s32.totalorder %s802_s8, %s802_s8 }
  0x15   :  { %p809_p8 = por %p808_p7, %p807_p6 }
  0x17   :  { %p810_p9 = pnand %p809_p8, %p803_p5 }
  0x19   :  { %813 = shalt.err (!%p810_p9)
}
  0x1a   :  { %s929_s9 = smov 64   ;;  %s930_s10 = smov 4  }
  0x1b   :  { %61 = dma.hbm_to_vmem [thread:$0]  %s1024_s3, 1024, %s56_s29, [#allocation9], %s929_s9, %s929_s9, %s930_s10  }
  0x1c   :  { %s822_s1 = scalar_lea.vmem %s23_s7, 128  ;;  %p827_p11 = scmp.lt.s32.totalorder %s23_s7, %s23_s7 }
  0x1d   :  { %p823_p10 = scmp.ne.s32.totalorder %s23_s7, %s822_s1  ;;  %p828_p12 = scmp.lt.s32.totalorder %s822_s1, %s822_s1 }
  0x1f   :  { %p829_p13 = por %p828_p12, %p827_p11 }
  0x21   :  { %p830_p0 = pnand %p829_p13, %p823_p10 }
  0x23   :  { %833 = shalt.err (!%p830_p0)
}
  0x24   :  { %25 = dma.hbm_to_vmem [thread:$0]  %s1021_s0, 128, %s23_s7, [#allocation3]  }
  0x25   :  { %s931_s15 = smov [#allocation7]   ;;  %s932_s17 = smov [#allocation10]  }
  0x26   :  { %s43_s16 = sshll.u32 %s931_s15, 4  ;;  %s67_s18 = sshll.u32 %s932_s17, 4  ;;  %s44_s16 = int_to_ptr.vmem [resolvable:$true] %s43_s16  ;;  %s68_s18 = int_to_ptr.vmem [resolvable:$true] %s67_s18 }
  0x27   :  { %s842_s19 = scalar_lea.vmem %s44_s16, 2048  ;;  %p847_p2 = scmp.lt.s32.totalorder %s44_s16, %s44_s16 }
  0x28   :  { %p843_p1 = scmp.ne.s32.totalorder %s44_s16, %s842_s19  ;;  %p848_p3 = scmp.lt.s32.totalorder %s842_s19, %s842_s19 }
  0x2a   :  { %p849_p4 = por %p848_p3, %p847_p2 }
  0x2c   :  { %p850_p5 = pnand %p849_p4, %p843_p1 }
  0x2e   :  { %853 = shalt.err (!%p850_p5)
}
  0x2f   :  { %49 = dma.hbm_to_vmem [thread:$0]  %s1023_s2, 2048, %s44_s16, [#allocation6], %s929_s9, %s929_s9, %s930_s10  }
  0x30   :  { %s862_s0 = scalar_lea.vmem %s68_s18, 1024  ;;  %p867_p7 = scmp.lt.s32.totalorder %s68_s18, %s68_s18 }
  0x31   :  { %p863_p6 = scmp.ne.s32.totalorder %s68_s18, %s862_s0  ;;  %p868_p8 = scmp.lt.s32.totalorder %s862_s0, %s862_s0 }
  0x33   :  { %p869_p9 = por %p868_p8, %p867_p7 }
  0x35   :  { %p870_p10 = pnand %p869_p9, %p863_p6 }
  0x37   :  { %873 = shalt.err (!%p870_p10)
}
  0x38   :  { %73 = dma.hbm_to_vmem [thread:$0]  %s1025_s4, 1024, %s68_s18, [#allocation9], %s929_s9, %s929_s9, %s930_s10  }
  0x39   :  { %s933_s23 = smov [#allocation11]  }
  0x3a   :  { %s80_s24 = sshll.u32 %s933_s23, 4  ;;  %s81_s24 = int_to_ptr.vmem [resolvable:$true] %s80_s24 }
  0x3b   :  { %s882_s25 = scalar_lea.vmem %s81_s24, 256  ;;  %p887_p12 = scmp.lt.s32.totalorder %s81_s24, %s81_s24 }
  0x3c   :  { %p883_p11 = scmp.ne.s32.totalorder %s81_s24, %s882_s25  ;;  %p888_p13 = scmp.lt.s32.totalorder %s882_s25, %s882_s25 }
  0x3e   :  { %p889_p0 = por %p888_p13, %p887_p12 }
  0x40   :  { %p890_p1 = pnand %p889_p0, %p883_p11 }
  0x42   :  { %893 = shalt.err (!%p890_p1)
}
  0x43   :  { %83 = dma.hbm_to_vmem [thread:$0]  %s1026_s5, 256, %s81_s24, [#allocation12]  }
  0x44   :  { %914 = dma.done.wait [#allocation3], 128  }
  0x45   :  { %915 = vsyncadd [#allocation3], 4294967168 }
  0x46   :  { %916 = dma.done.wait [#allocation6], 2560  }
  0x47   :  { %917 = vsyncadd [#allocation6], 4294964736 }
  0x48   :  { %918 = dma.done.wait [#allocation9], 2048  }
  0x49   :  { %919 = vsyncadd [#allocation9], 4294965248 }
  0x4a   :  { %920 = dma.done.wait [#allocation12], 256  }
  0x4b   :  { %921 = vsyncadd [#allocation12], 4294967040  ;;  %v934_v0 = vmov 0   ;;  %v732_v1 = vld [vmem:[#allocation5 + $0x14] ss:$8 sps:$4 sm:$0xff]   ;;  %vm141_vm0 = vcmask 261120   ;;  %v111_v29 = vlaneseq }
  0x4c   :  { %177 = vmatprep.mubr.bf16.mxu0 %v934_v0  ;;  %v734_v2 = vld [vmem:[#allocation5 + $0x10] ss:$8 sps:$4 sm:$0xff]   ;;  %157 = vmatprep.subr.bf16.mxu0 %v732_v1  ;;  %v735_v3 = vld [vmem:[#allocation5 + $0x4] ss:$8 sps:$4 sm:$0xff]   ;;  %v737_v4 = vld [vmem:[#allocation5] ss:$8 sps:$4 sm:$0xff]  }
  0x4d   :  { %v103_v5 = vld [vmem:[#allocation2] sm:$0xff]  ;;  %158 = vmatpush1.bf16.msra.mxu0 %v734_v2  ;;  %v740_v8 = vld [vmem:[#allocation7 + $0x70] sm:$0xff]   ;;  %v742_v11 = vld [vmem:[#allocation7 + $0x68] sm:$0xff]   ;;  %v935_v24 = vmov 0.0   ;;  %v112_v30 = vshrl.u32 %v111_v29, 7  ;;  %vm936_vm1 = vmmov 0  }
  0x4e   :  { %v738_v6 = vld [vmem:[#allocation7 + $0x78] sm:$0xff]   ;;  %159 = vmatprep.subr.bf16.mxu0 %v735_v3  ;;  %v104_v9 = vpack.c.bf16 %v103_v5, %v103_v5  ;;  %v741_v10 = vld [vmem:[#allocation7 + $0x30] sm:$0xff]   ;;  %v743_v12 = vld [vmem:[#allocation7 + $0x28] sm:$0xff]   ;;  %s937_s4 = smov [#allocation13]  }
  0x4f   :  { %v739_v7 = vld [vmem:[#allocation7 + $0x38] sm:$0xff]   ;;  %638 = vmatprep.subr.bf16.mxu1 %v738_v6  ;;  %v744_v13 = vld [vmem:[#allocation7 + $0x60] sm:$0xff]   ;;  %v748_v17 = vld [vmem:[#allocation7 + $0x50] sm:$0xff]   ;;  %v113_v31 = vsub.s32 0, %v112_v30  ;;  %v117_v33 = vsub.s32 1, %v112_v30  ;;  %s588_s5 = sshll.u32 %s937_s4, 4  ;;  %s589_s5 = int_to_ptr.vmem [resolvable:$true] %s588_s5 }
  0x50   :  { %639 = vmatpush3.bf16.msra.mxu1 %v739_v7  ;;  %v745_v14 = vld [vmem:[#allocation7 + $0x20] sm:$0xff]   ;;  %v746_v15 = vld [vmem:[#allocation7 + $0x58] sm:$0xff]   ;;  %v749_v18 = vld [vmem:[#allocation7 + $0x10] sm:$0xff]   ;;  %s894_s27 = scalar_lea.vmem %s589_s5, 64  ;;  %p899_p3 = scmp.lt.s32.totalorder %s589_s5, %s589_s5 }
  0x51   :  { %160 = vmatpush1.bf16.msra.mxu0 %v737_v4  ;;  %640 = vmatprep.subr.bf16.mxu1 %v740_v8  ;;  %v747_v16 = vld [vmem:[#allocation7 + $0x18] sm:$0xff]   ;;  %v750_v19 = vld [vmem:[#allocation7 + $0x48] sm:$0xff]   ;;  %v752_v21 = vld [vmem:[#allocation7 + $0x40] sm:$0xff]   ;;  %p895_p2 = scmp.ne.s32.totalorder %s589_s5, %s894_s27  ;;  %p900_p4 = scmp.lt.s32.totalorder %s894_s27, %s894_s27 }
  0x52   :  { %v751_v20 = vld [vmem:[#allocation7 + $0x8] sm:$0xff]   ;;  %v753_v22 = vld [vmem:[#allocation7] sm:$0xff]   ;;  %v754_v23 = vld [vmem:[#allocation8 + $0x38] sm:$0xff]   ;;  %678 = vmatprep.subr.bf16.mxu0 %v935_v24 }
  0x53   :  { %v755_v25 = vld [vmem:[#allocation8 + $0x30] sm:$0xff]   ;;  %v756_v26 = vld [vmem:[#allocation8 + $0x28] sm:$0xff]   ;;  %v757_v27 = vld [vmem:[#allocation8 + $0x20] sm:$0xff]   ;;  %p901_p5 = por %p900_p4, %p899_p3 }
  0x54   :  { %604 = vmatmul.mubr.msk.bf16.vlgmr.msra.gmra.mxu0 %vm141_vm0, %v104_v9  ;;  %641 = vmatpush3.bf16.msra.mxu1 %v741_v10  ;;  %v758_v28 = vld [vmem:[#allocation8 + $0x18] sm:$0xff]   ;;  %v109_v32 = vld [vmem:[#allocation11] ss:$8 sm:$0x3]  ;;  %v759_v46 = vld [vmem:[#allocation8 + $0x10] sm:$0xff]  }
  0x55   :  { %642 = vmatprep.subr.bf16.mxu1 %v742_v11  ;;  %679 = vmatpush3.bf16.msra.mxu0 %v754_v23  ;;  %v114_v34 = vrot.slane %v109_v32, %v113_v31  ;;  %v118_v35 = vrot.slane %v109_v32, %v117_v33  ;;  %v760_v47 = vld [vmem:[#allocation8 + $0x8] sm:$0xff]   ;;  %v761_v48 = vld [vmem:[#allocation8] sm:$0xff]   ;;  %v762_v49 = vld [vmem:[#allocation10 + $0x38] sm:$0xff]   ;;  %p902_p6 = pnand %p901_p5, %p895_p2 }
  0x56   :  { %680 = vmatprep.subr.bf16.mxu0 %v935_v24  ;;  %694 = vmatprep.mubr.msk.bf16.mxu0 %vm936_vm1, %v935_v24  ;;  %v763_v50 = vld [vmem:[#allocation10 + $0x30] sm:$0xff]   ;;  %v764_v51 = vld [vmem:[#allocation10 + $0x28] sm:$0xff]   ;;  %v765_v52 = vld [vmem:[#allocation10 + $0x20] sm:$0xff]  }
  0x57   :  { %v766_v53 = vld [vmem:[#allocation10 + $0x18] sm:$0xff]   ;;  %v767_v54 = vld [vmem:[#allocation10 + $0x10] sm:$0xff]   ;;  %v222_v56 = vld [vmem:[#allocation11 + $0x1] ss:$0 sm:$0xff] }
  0x58   :  { %643 = vmatpush3.bf16.msra.mxu1 %v743_v12  ;;  %v768_v0 = vld [vmem:[#allocation10 + $0x8] sm:$0xff]   ;;  %v769_v1 = vld [vmem:[#allocation10] sm:$0xff]  }
  0x59   :  { %644 = vmatprep.subr.bf16.mxu1 %v744_v13  ;;  %681 = vmatpush3.bf16.msra.mxu0 %v755_v25  ;;  %v377_v2 = vld [vmem:[#allocation11 + $0x2] ss:$0 sm:$0xff]  ;;  %v484_v10 = vld [vmem:[#allocation11 + $0x3] ss:$0 sm:$0xff] }
  0x5a   :  { %682 = vmatprep.subr.bf16.mxu0 %v935_v24 }
  0x5c   :  { %645 = vmatpush3.bf16.msra.mxu1 %v745_v14 }
  0x5d   :  { %646 = vmatprep.subr.bf16.mxu1 %v746_v15  ;;  %683 = vmatpush3.bf16.msra.mxu0 %v756_v26 }
  0x5e   :  { %684 = vmatprep.subr.bf16.mxu0 %v935_v24 }
  0x60   :  { %647 = vmatpush3.bf16.msra.mxu1 %v747_v16 }
  0x61   :  { %648 = vmatprep.subr.bf16.mxu1 %v748_v17  ;;  %685 = vmatpush3.bf16.msra.mxu0 %v757_v27 }
  0x62   :  { %686 = vmatprep.subr.bf16.mxu0 %v935_v24 }
  0x64   :  { %649 = vmatpush3.bf16.msra.mxu1 %v749_v18 }
  0x65   :  { %650 = vmatprep.subr.bf16.mxu1 %v750_v19  ;;  %687 = vmatpush3.bf16.msra.mxu0 %v758_v28 }
  0x66   :  { %688 = vmatprep.subr.bf16.mxu0 %v935_v24 }
  0x68   :  { %651 = vmatpush3.bf16.msra.mxu1 %v751_v20 }
  0x69   :  { %652 = vmatprep.subr.bf16.mxu1 %v752_v21  ;;  %689 = vmatpush3.bf16.msra.mxu0 %v759_v46 }
  0x6a   :  { %690 = vmatprep.subr.bf16.mxu0 %v935_v24 }
  0x6c   :  { %653 = vmatpush3.bf16.msra.mxu1 %v753_v22 }
  0x6d   :  { %698 = vmatprep.subr.bf16.mxu1 %v935_v24  ;;  %691 = vmatpush3.bf16.msra.mxu0 %v760_v47 }
  0x6e   :  { %692 = vmatprep.subr.bf16.mxu0 %v935_v24 }
  0x71   :  { %693 = vmatpush3.bf16.msra.mxu0 %v761_v48 }
 0x114   :  { %v179_v36 = vpop.f32.mrf.mxu0 }
 0x115   :  { %v180_v37 = vadd.f32 %v179_v36, %v114_v34 }
 0x116   :  { %v181_v38 = vpop.f32.mrf.mxu0 }
 0x117   :  { %v182_v39 = vadd.f32 %v181_v38, %v118_v35  ;;  %v186_v40 = vmax.f32 %v180_v37, 0.0 }
 0x118   :  { %v183_v41 = vpop.f32.mrf.mxu0 }
 0x119   :  { %v187_v42 = vmax.f32 %v182_v39, 0.0  ;;  %v188_v45 = vpack.c.bf16 %v186_v40, %v186_v40 }
 0x11a   :  { %v184_v43 = vpop.f32.mrf.mxu0 }
 0x11b   :  { %v189_v44 = vpack.c.bf16 %v187_v42, %v187_v42 }
 0x11d   :  { %351 = vmatprep.mubr.bf16.mxu1 %v189_v44 }
 0x11e   :  { %352 = vmatmul.mubr.bf16.vlgmr.msra.gmra.mxu1 %v188_v45 }
 0x11f   :  { %714 = vmatprep.mubr.msk.bf16.mxu1 %vm936_vm1, %v935_v24  ;;  %699 = vmatpush3.bf16.msra.mxu1 %v762_v49 }
 0x120   :  { %700 = vmatprep.subr.bf16.mxu1 %v935_v24 }
 0x123   :  { %701 = vmatpush3.bf16.msra.mxu1 %v763_v50 }
 0x124   :  { %702 = vmatprep.subr.bf16.mxu1 %v935_v24 }
 0x127   :  { %703 = vmatpush3.bf16.msra.mxu1 %v764_v51 }
 0x128   :  { %704 = vmatprep.subr.bf16.mxu1 %v935_v24 }
 0x12b   :  { %705 = vmatpush3.bf16.msra.mxu1 %v765_v52 }
 0x12c   :  { %706 = vmatprep.subr.bf16.mxu1 %v935_v24 }
 0x12f   :  { %707 = vmatpush3.bf16.msra.mxu1 %v766_v53 }
 0x130   :  { %708 = vmatprep.subr.bf16.mxu1 %v935_v24 }
 0x133   :  { %709 = vmatpush3.bf16.msra.mxu1 %v767_v54 }
 0x134   :  { %710 = vmatprep.subr.bf16.mxu1 %v935_v24 }
 0x137   :  { %711 = vmatpush3.bf16.msra.mxu1 %v768_v0 }
 0x138   :  { %712 = vmatprep.subr.bf16.mxu1 %v935_v24 }
 0x13b   :  { %713 = vmatpush3.bf16.msra.mxu1 %v769_v1 }
 0x1de   :  { %v654_v55 = vpop.f32.mrf.mxu1 }
 0x1e0   :  { %v655_v57 = vpop.f32.mrf.mxu1 }
 0x1e1   :  { %v656_v58 = vadd.f32 %v655_v57, %v654_v55 }
 0x1e2   :  { %v657_v59 = vpop.f32.mrf.mxu1 }
 0x1e3   :  { %v354_v60 = vadd.f32 %v656_v58, %v222_v56 }
 0x1e4   :  { %v658_v61 = vpop.f32.mrf.mxu1 }
 0x1e5   :  { %v359_v62 = vmax.f32 %v354_v60, 0.0 }
 0x1e7   :  { %v360_v63 = vpack.c.bf16 %v359_v62, %v359_v62 }
 0x1e9   :  { %695 = vmatmul.mubr.bf16.vlgmr.msra.gmra.mxu0 %v360_v63 }
 0x2a9   :  { %v460_v3 = vpop.f32.mrf.mxu0 }
 0x2aa   :  { %v461_v4 = vadd.f32 %v460_v3, %v377_v2 }
 0x2ab   :  { %v696_v5 = vpop.f32.mrf.mxu0 }
 0x2ac   :  { %v466_v6 = vmax.f32 %v461_v4, 0.0 }
 0x2ad   :  { %v463_v7 = vpop.f32.mrf.mxu0 }
 0x2ae   :  { %v467_v8 = vpack.c.bf16 %v466_v6, %v466_v6 }
 0x2af   :  { %v697_v9 = vpop.f32.mrf.mxu0 }
 0x2b0   :  { %715 = vmatmul.mubr.bf16.vlgmr.msra.gmra.mxu1 %v467_v8 }
 0x370   :  { %v567_v11 = vpop.f32.mrf.mxu1 }
 0x371   :  { %v568_v12 = vadd.f32 %v567_v11, %v484_v10 }
 0x372   :  { %v716_v13 = vpop.f32.mrf.mxu1 }
 0x373   :  { %v637_v14 = vmul.f32 -1.442695, %v568_v12 }
 0x374   :  { %v570_v15 = vpop.f32.mrf.mxu1 }
 0x375   :  { %770 = vpow2.f32 %v637_v14 }
 0x376   :  { %v717_v16 = vpop.f32.mrf.mxu1 }
 0x382   :  { %v771_v17 = vpop.eup %770 }
 0x383   :  { %v576_v18 = vadd.f32 1.0, %v771_v17 }
 0x385   :  { %772 = vrcp.f32 %v576_v18 }
 0x392   :  { %v773_v19 = vpop.eup %772 }
 0x393   :  { %v579_v20 = vmul.f32 2.0, %v773_v19 }
 0x395   :  { %v580_v21 = vpack.c.bf16 %v579_v20, %v579_v20 }
 0x397   :  { %581 = vst [vmem:[#allocation13] sm:$0xf] %v580_v21 }
 0x398   :  { %905 = shalt.err (!%p902_p6)
}
 0x399   :  { %591 = dma.vmem_to_hbm [thread:$0]  %s589_s5, 64, %s1027_s6, [#allocation4]  }
 0x39a   :  { %922 = dma.done.wait [#allocation4], 64  }
 0x39b   :  { %923 = vsyncadd [#allocation4], 4294967232 }
 0x39c   :  { %595 = vsyncpa [#allocation3], 1 }
 0x39d   :  { %596 = vsyncpa [#allocation6], 1 }
 0x39e   :  { %597 = vsyncpa [#allocation9], 1 }
 0x39f   :  { %598 = vsyncpa [#allocation12], 1 }
 0x3a0   :  { %599 = vsyncpa [#allocation4], 1 }

</bundles_post_ra>
